<compile_context>
chip_gen: v5e
topology: v5e:2x2
jax: 0.10.0
libtpu: 0.0.40
codegen_flags: <defaults>
</compile_context>

<pallas_src>
import functools

import jax
import jax.numpy as jnp
from jax.experimental import pallas as pl
from jax.experimental.pallas import tpu as pltpu

EPS = 1e-6


def gem_head_kernel(p_ref, bias_ref, x_ref, w_ref, o_ref, *, use_cube, inv_s):
    """Fused GeM pooling + Linear(C->1) + Sigmoid over one batch tile.

    p_ref:    (1, 1) f32 SMEM   -- GeM exponent p
    bias_ref: (1, 1) f32 SMEM   -- linear bias
    x_ref:    (TB, S, C) VMEM   -- channels-last features (C on lanes), native dtype
    w_ref:    (C, 1)  f32 VMEM  -- linear weight as a column vector
    o_ref:    (TB, 1) f32 VMEM  -- sigmoid(logits)
    """
    p = p_ref[0, 0]
    inv_p = 1.0 / p

    # Cast per-tile to f32 (transport is native/bf16, compute is f32 everywhere).
    x = x_ref[...].astype(jnp.float32)          # (TB, S, C)
    xc = jnp.maximum(x, EPS)                    # clamp(min=eps) -> strictly positive

    if use_cube:
        # p == 3 (static): pure VPU multiplies, no per-element EUP work.
        xp = xc * xc * xc
    else:
        # general learned p: x^p = exp(p * log(x)) (x > 0 after clamp).
        xp = jnp.exp(p * jnp.log(xc))

    # avg_pool2d over the full spatial extent == mean over S (sublane axis).
    pooled = jnp.sum(xp, axis=1) * inv_s        # (TB, C), strictly positive
    gem = jnp.exp(inv_p * jnp.log(pooled))      # pooled ** (1/p), only O(TB*C) EUP

    # Linear(C -> 1) on the MXU (otherwise idle in this kernel).
    w = w_ref[...].astype(jnp.float32)          # (C, 1)
    logits = jnp.dot(gem, w, preferred_element_type=jnp.float32) + bias_ref[0, 0]

    o_ref[...] = jax.nn.sigmoid(logits)         # (TB, 1)


def _pick_tile_b(B, tile_b):
    """Full batch, or a multiple of 8 (keeps the (TB, 1) output block legal)."""
    tile_b = max(1, min(tile_b, B))
    if tile_b >= B:
        return B
    return max(8, (tile_b // 8) * 8)


def image_model_head(features_nchw, p, weight, bias, *, tile_b=8, static_p=None):
    """features_nchw: (B, C, H, W); p: (1,); weight: (1, C); bias: (1,).

    `static_p`: optional Python float; if it equals 3.0 the kernel uses the
    VPU cube fast path (caller guarantees p == static_p).
    """
    B, C, H, W = features_nchw.shape
    S = H * W
    # Channels-last, native dtype (no f32 upcast in the wrapper -> half HBM
    # traffic for bf16 backbones). Layout glue stays in XLA outside the kernel.
    x = jnp.transpose(features_nchw, (0, 2, 3, 1)).reshape(B, S, C)

    p2 = p.reshape(1, 1).astype(jnp.float32)
    b2 = bias.reshape(1, 1).astype(jnp.float32)
    w2 = weight.reshape(C, 1).astype(jnp.float32)

    tile_b = _pick_tile_b(B, tile_b)
    grid = (pl.cdiv(B, tile_b),)

    use_cube = (static_p is not None) and float(static_p) == 3.0
    kernel = functools.partial(gem_head_kernel, use_cube=use_cube, inv_s=1.0 / S)

    return pl.pallas_call(
        kernel,
        out_shape=jax.ShapeDtypeStruct((B, 1), jnp.float32),
        grid=grid,
        in_specs=[
            pl.BlockSpec(memory_space=pltpu.MemorySpace.SMEM),        # p
            pl.BlockSpec(memory_space=pltpu.MemorySpace.SMEM),        # bias
            pl.BlockSpec((tile_b, S, C), lambda i: (i, 0, 0)),        # features tile
            pl.BlockSpec((C, 1), lambda i: (0, 0)),                   # weight
        ],
        out_specs=pl.BlockSpec((tile_b, 1), lambda i: (i, 0)),
        compiler_params=pltpu.CompilerParams(
            dimension_semantics=("parallel",),                        # megacore on v7x
        ),
    )(p2, b2, x, w2)


def _reference(features_nchw, p, weight, bias):
    """Pure-JAX reference mirroring the PyTorch forward (GeM + Linear + Sigmoid)."""
    x = features_nchw.astype(jnp.float32)
    pv = p.astype(jnp.float32)[0]
    pooled = jnp.mean(jnp.clip(x, EPS, None) ** pv, axis=(-2, -1))    # (B, C)
    gem = pooled ** (1.0 / pv)
    logits = gem @ weight.reshape(-1, 1).astype(jnp.float32) + bias.astype(jnp.float32)
    return jax.nn.sigmoid(logits)                                     # (B, 1)


if __name__ == "__main__":
    # Small backbone-feature-shaped input (B, C, H, W); C lane-dense (multiple of 128).
    B, C, H, W = 4, 128, 4, 4
    key = jax.random.PRNGKey(0)
    k_feat, k_w, k_b = jax.random.split(key, 3)

    # Backbone features in their native bf16 (kernel casts to f32 internally).
    features = jax.random.uniform(k_feat, (B, C, H, W), dtype=jnp.float32)
    features = features.astype(jnp.bfloat16)

    # Parameters per module __init__: GeM p = ones(1)*3, Linear(C, 1).
    p_param = jnp.ones((1,), dtype=jnp.float32) * 3.0
    lin_w = jax.random.normal(k_w, (1, C), dtype=jnp.float32) * 0.02
    lin_b = jax.random.normal(k_b, (1,), dtype=jnp.float32) * 0.02

    # Fast path (static p == 3 -> VPU cube).
    out_static = image_model_head(features, p_param, lin_w, lin_b, static_p=3.0)
    out_static = jax.block_until_ready(out_static)

    # General path (learned / dynamic p -> exp(p*log(x))).
    out_dyn = image_model_head(features, p_param, lin_w, lin_b)
    out_dyn = jax.block_until_ready(out_dyn)

    ref = _reference(features, p_param, lin_w, lin_b)

    assert out_static.shape == (B, 1)
    assert jnp.allclose(out_static, ref, atol=1e-5, rtol=1e-4), (out_static, ref)
    assert jnp.allclose(out_dyn, ref, atol=1e-5, rtol=1e-4), (out_dyn, ref)

    print("KERNEL_OK")
</pallas_src>

<mosaic_0001>
module attributes {stable_mosaic.version = 11 : i64} {
  func.func @gem_head_kernel(%arg0: i32, %arg1: memref<1x1xf32, #tpu.memory_space<smem>>, %arg2: memref<1x1xf32, #tpu.memory_space<smem>>, %arg3: memref<4x16x128xbf16, #tpu.memory_space<vmem>>, %arg4: memref<128x1xf32, #tpu.memory_space<vmem>>, %arg5: memref<4x1xf32, #tpu.memory_space<vmem>>) attributes {dimension_semantics = [#tpu.dimension_semantics<parallel>], iteration_bounds = array<i64: 1>, scalar_prefetch = 0 : i64, scratch_operands = 0 : i64, tpu.core_type = #tpu.core_type<tc>, window_params = [{transform_indices = @transform_0, window_bounds = array<i64: 1, 1>}, {transform_indices = @transform_1, window_bounds = array<i64: 1, 1>}, {transform_indices = @transform_2, window_bounds = array<i64: 4, 16, 128>}, {pipeline_mode = #tpu.pipeline_mode<synchronous>, transform_indices = @transform_3, window_bounds = array<i64: 128, 1>}, {transform_indices = @transform_4, window_bounds = array<i64: 4, 1>}]} {
    %c0 = arith.constant 0 : index
    %c0_0 = arith.constant 0 : index
    %0 = memref.load %arg1[%c0, %c0_0] : memref<1x1xf32, #tpu.memory_space<smem>>
    %cst = arith.constant 1.000000e+00 : f32
    %1 = arith.divf %cst, %0 : f32
    %c0_1 = arith.constant 0 : index
    %c0_2 = arith.constant 0 : index
    %c0_3 = arith.constant 0 : index
    %2 = vector.load %arg3[%c0_1, %c0_2, %c0_3] : memref<4x16x128xbf16, #tpu.memory_space<vmem>>, vector<4x16x128xbf16>
    %3 = arith.extf %2 : vector<4x16x128xbf16> to vector<4x16x128xf32>
    %cst_4 = arith.constant 9.99999997E-7 : f32
    %4 = vector.broadcast %cst_4 : f32 to vector<4x16x128xf32>
    %5 = arith.maximumf %3, %4 : vector<4x16x128xf32>
    %6 = arith.mulf %5, %5 : vector<4x16x128xf32>
    %7 = arith.mulf %6, %5 : vector<4x16x128xf32>
    %cst_5 = arith.constant dense<0.000000e+00> : vector<4x128xf32>
    %8 = vector.multi_reduction <add>, %7, %cst_5 [1] : vector<4x16x128xf32> to vector<4x128xf32>
    %cst_6 = arith.constant 6.250000e-02 : f32
    %9 = vector.broadcast %cst_6 : f32 to vector<4x128xf32>
    %10 = arith.mulf %8, %9 : vector<4x128xf32>
    %11 = math.log %10 : vector<4x128xf32>
    %12 = vector.broadcast %1 : f32 to vector<4x128xf32>
    %13 = arith.mulf %12, %11 : vector<4x128xf32>
    %14 = math.exp %13 : vector<4x128xf32>
    %c0_7 = arith.constant 0 : index
    %c0_8 = arith.constant 0 : index
    %15 = vector.load %arg4[%c0_7, %c0_8] : memref<128x1xf32, #tpu.memory_space<vmem>>, vector<128x1xf32>
    %cst_9 = arith.constant dense<0.000000e+00> : vector<4x1xf32>
    %16 = tpu.matmul %14, %15, %cst_9 {dimension_numbers = #tpu.dot_dimension_numbers<[1], [0], [0], [1], [0, 0, 1, 1], [], []>} : vector<4x128xf32>, vector<128x1xf32>, vector<4x1xf32> -> vector<4x1xf32>
    %c0_10 = arith.constant 0 : index
    %c0_11 = arith.constant 0 : index
    %17 = memref.load %arg2[%c0_10, %c0_11] : memref<1x1xf32, #tpu.memory_space<smem>>
    %18 = vector.broadcast %17 : f32 to vector<4x1xf32>
    %19 = arith.addf %16, %18 : vector<4x1xf32>
    %20 = arith.negf %19 : vector<4x1xf32>
    %21 = math.exp %20 : vector<4x1xf32>
    %cst_12 = arith.constant 1.000000e+00 : f32
    %22 = vector.broadcast %cst_12 : f32 to vector<4x1xf32>
    %23 = arith.addf %22, %21 : vector<4x1xf32>
    %24 = arith.divf %22, %23 : vector<4x1xf32>
    %c0_13 = arith.constant 0 : index
    %c0_14 = arith.constant 0 : index
    %25 = vector.load %arg5[%c0_13, %c0_14] : memref<4x1xf32, #tpu.memory_space<vmem>>, vector<4x1xf32>
    tpu.vector_store %arg5[%c0_13, %c0_14], %24 {strides = array<i32>} : memref<4x1xf32, #tpu.memory_space<vmem>>, vector<4x1xf32>,
    return
  }
  func.func @transform_0(%arg0: i32) -> (i32, i32) {
    %c0_i32 = arith.constant 0 : i32
    %c0_i32_0 = arith.constant 0 : i32
    %c0_i32_1 = arith.constant 0 : i32
    return %c0_i32, %c0_i32_0 : i32, i32
  }
  func.func @transform_1(%arg0: i32) -> (i32, i32) {
    %c0_i32 = arith.constant 0 : i32
    %c0_i32_0 = arith.constant 0 : i32
    %c0_i32_1 = arith.constant 0 : i32
    return %c0_i32, %c0_i32_0 : i32, i32
  }
  func.func @transform_2(%arg0: i32) -> (i32, i32, i32) {
    %c0_i32 = arith.constant 0 : i32
    %c0_i32_0 = arith.constant 0 : i32
    %c0_i32_1 = arith.constant 0 : i32
    return %arg0, %c0_i32, %c0_i32_0 : i32, i32, i32
  }
  func.func @transform_3(%arg0: i32) -> (i32, i32) {
    %c0_i32 = arith.constant 0 : i32
    %c0_i32_0 = arith.constant 0 : i32
    %c0_i32_1 = arith.constant 0 : i32
    return %c0_i32, %c0_i32_0 : i32, i32
  }
  func.func @transform_4(%arg0: i32) -> (i32, i32) {
    %c0_i32 = arith.constant 0 : i32
    %c0_i32_0 = arith.constant 0 : i32
    return %arg0, %c0_i32 : i32, i32
  }
}

</mosaic_0001>

<bundles_post_ra>
// kernel: tpu_custom_call.1
= control target key start
LH: loop header
LB: loop body
LE: loop exit
PB: predicated region body
PF: predicated region fallthrough
CT: control target
= control target key end

     0   :  { %vm151_vm4 = vcmask 1041409   ;;  %vm153_vm5 = vcmask 1042434   ;;  %vm155_vm6 = vcmask 1043459   ;;  %vm197_vm10 = vcmask 3072   ;;  %s348_s0 = inlined_call_operand.<no memory space> [shape: f32[1,1], index: 0, kind: input, shape index: {}]   ;;  %s349_s3 = inlined_call_operand.vmem [shape: f32[128,1], index: 3, kind: input, shape index: {}]   ;;  %s350_s2 = inlined_call_operand.vmem [shape: bf16[4,16,128], index: 2, kind: input, shape index: {}]   ;;  %s351_s1 = inlined_call_operand.<no memory space> [shape: f32[1,1], index: 1, kind: input, shape index: {}]   ;;  %s352_s4 = inlined_call_operand.vmem [shape: f32[4,1], index: 4, kind: output, shape index: {}]  }
   0x1   :  { %v20_v0 = vstv %s348_s0  ;;  %v144_v1 = vld [vmem:[%s349_s3 + $0x78] sm:$0xff]  ;;  %v143_v2 = vld [vmem:[%s349_s3 + $0x70] sm:$0xff]  ;;  %v142_v3 = vld [vmem:[%s349_s3 + $0x68] sm:$0xff] }
   0x2   :  { %225 = vrcp.f32 %v20_v0  ;;  %158 = vmatpush.msra.mxu0 %v144_v1  ;;  %v205_v4 = vld [vmem:[%s350_s2] sm:$0xff]   ;;  %v220_v5 = vld [vmem:[%s350_s2 + $0x8] sm:$0xff]   ;;  %v221_v7 = vld [vmem:[%s350_s2 + $0x10] sm:$0xff]   ;;  %v30_v18 = vand.u32 2147483647, %v20_v0  ;;  %vm26_vm0 = vweird.f32 %v20_v0  ;;  %v32_v22 = vand.u32 2147483648, %v20_v0 }
   0x3   :  { %v141_v6 = vld [vmem:[%s349_s3 + $0x60] sm:$0xff]  ;;  %v206_v8 = vunpack.c.l.bf16 %v205_v4  ;;  %v207_v9 = vunpack.c.h.bf16 %v205_v4  ;;  %v222_v10 = vld [vmem:[%s350_s2 + $0x18] sm:$0xff]   ;;  %v210_v12 = vunpack.c.l.bf16 %v220_v5  ;;  %v211_v13 = vunpack.c.h.bf16 %v220_v5  ;;  %v139_v19 = vld [vmem:[%s349_s3 + $0x50] sm:$0xff] }
   0x4   :  { %159 = vmatpush.msra.mxu0 %v143_v2  ;;  %v140_v11 = vld [vmem:[%s349_s3 + $0x58] sm:$0xff]  ;;  %v214_v15 = vunpack.c.l.bf16 %v221_v7  ;;  %v215_v16 = vunpack.c.h.bf16 %v221_v7  ;;  %v218_v20 = vunpack.c.l.bf16 %v222_v10  ;;  %v219_v21 = vunpack.c.h.bf16 %v222_v10  ;;  %v138_v26 = vld [vmem:[%s349_s3 + $0x48] sm:$0xff]  ;;  %v137_v32 = vld [vmem:[%s349_s3 + $0x40] sm:$0xff] }
   0x5   :  { %v52_v23 = vmax.f32 %v206_v8, 1e-06  ;;  %v53_v24 = vmax.f32 %v207_v9, 1e-06  ;;  %v54_v27 = vmax.f32 %v210_v12, 1e-06 }
   0x6   :  { %160 = vmatpush.msra.mxu0 %v142_v3  ;;  %v55_v28 = vmax.f32 %v211_v13, 1e-06  ;;  %v56_v29 = vmax.f32 %v214_v15, 1e-06  ;;  %v57_v30 = vmax.f32 %v215_v16, 1e-06 }
   0x7   :  { %v58_v33 = vmax.f32 %v218_v20, 1e-06  ;;  %v59_v34 = vmax.f32 %v219_v21, 1e-06  ;;  %v33_v36 = vor.u32 1.1754944e-38, %v32_v22  ;;  %v60_v37 = vmul.f32 %v52_v23, %v52_v23  ;;  %v136_v10 = vld [vmem:[%s349_s3 + $0x38] sm:$0xff] }
   0x8   :  { %v226_v14 = vpop.eup %225  ;;  %161 = vmatpush.msra.mxu0 %v141_v6  ;;  %v61_v38 = vmul.f32 %v53_v24, %v53_v24  ;;  %vm31_vm3 = vcmp.eq.f32.partialorder %v30_v18, 8.507059e+37  ;;  %v62_v40 = vmul.f32 %v54_v27, %v54_v27  ;;  %v63_v41 = vmul.f32 %v55_v28, %v55_v28  ;;  %v135_v13 = vld [vmem:[%s349_s3 + $0x30] sm:$0xff]  ;;  %v134_v16 = vld [vmem:[%s349_s3 + $0x28] sm:$0xff]  ;;  %v132_v20 = vld [vmem:[%s349_s3 + $0x18] sm:$0xff] }
   0x9   :  { %v22_v17 = vmul.f32 %v226_v14, %v20_v0  ;;  %vm27_vm1 = vweird.f32 %v226_v14  ;;  %v64_v42 = vmul.f32 %v56_v29, %v56_v29  ;;  %v65_v43 = vmul.f32 %v57_v30, %v57_v30 }
   0xa   :  { %162 = vmatpush.msra.mxu0 %v140_v11  ;;  %vm312_vm2 = vmor %vm26_vm0, %vm27_vm1  ;;  %v66_v45 = vmul.f32 %v58_v33, %v58_v33  ;;  %v67_v46 = vmul.f32 %v59_v34, %v59_v34  ;;  %v68_v48 = vmul.f32 %v60_v37, %v52_v23  ;;  %v69_v49 = vmul.f32 %v61_v38, %v53_v24  ;;  %v131_v23 = vld [vmem:[%s349_s3 + $0x10] sm:$0xff] }
   0xb   :  { %v23_v25 = vsub.f32 1.0, %v22_v17  ;;  %v70_v50 = vmul.f32 %v62_v40, %v54_v27  ;;  %v71_v51 = vmul.f32 %v63_v41, %v55_v28  ;;  %v72_v52 = vmul.f32 %v64_v42, %v56_v29  ;;  %v129_v29 = vld [vmem:[%s349_s3] sm:$0xff] }
   0xc   :  { %163 = vmatpush.msra.mxu0 %v139_v19  ;;  %v73_v53 = vmul.f32 %v65_v43, %v57_v30  ;;  %v74_v54 = vmul.f32 %v66_v45, %v58_v33  ;;  %v75_v55 = vmul.f32 %v67_v46, %v59_v34  ;;  %v76_v56 = vadd.f32 %v69_v49, %v68_v48  ;;  %v133_v19 = vld [vmem:[%s349_s3 + $0x20] sm:$0xff] }
   0xd   :  { %v24_v31 = vmul.f32 %v226_v14, %v23_v25  ;;  %v83_v57 = vadd.f32 %v71_v51, %v70_v50 }
   0xe   :  { %164 = vmatpush.msra.mxu0 %v138_v26  ;;  %v90_v58 = vadd.f32 %v73_v53, %v72_v52  ;;  %v97_v59 = vadd.f32 %v75_v55, %v74_v54  ;;  %v77_v60 = vrot.slane %v76_v56, 4  ;;  %v130_v26 = vld [vmem:[%s349_s3 + $0x8] sm:$0xff] }
   0xf   :  { %v25_v39 = vadd.f32 %v226_v14, %v24_v31  ;;  %v84_v61 = vrot.slane %v83_v57, 4 }
  0x10   :  { %165 = vmatpush.msra.mxu0 %v137_v32  ;;  %v91_v62 = vrot.slane %v90_v58, 4  ;;  %v98_v63 = vrot.slane %v97_v59, 4  ;;  %v78_v0 = vadd.f32 %v77_v60, %v76_v56  ;;  %v146_v56 = vstv %s351_s1 }
  0x11   :  { %v29_v44 = vsel %vm312_vm2, %v226_v14, %v25_v39  ;;  %v85_v1 = vadd.f32 %v84_v61, %v83_v57 }
  0x12   :  { %v34_v47 = vsel %vm31_vm3, %v33_v36, %v29_v44  ;;  %v92_v2 = vadd.f32 %v91_v62, %v90_v58  ;;  %v99_v3 = vadd.f32 %v98_v63, %v97_v59  ;;  %v79_v4 = vrot.slane %v78_v0, 2  ;;  %166 = vmatpush.msra.mxu0 %v136_v10 }
  0x13   :  { %223 = vpush %v34_v47  ;;  %v86_v5 = vrot.slane %v85_v1, 2 }
  0x14   :  { %v93_v6 = vrot.slane %v92_v2, 2  ;;  %v100_v7 = vrot.slane %v99_v3, 2  ;;  %v80_v8 = vadd.f32 %v79_v4, %v78_v0  ;;  %167 = vmatpush.msra.mxu0 %v135_v13 }
  0x15   :  { %v87_v9 = vadd.f32 %v86_v5, %v85_v1 }
  0x16   :  { %v94_v11 = vadd.f32 %v93_v6, %v92_v2  ;;  %v101_v12 = vadd.f32 %v100_v7, %v99_v3  ;;  %v81_v14 = vrot.slane %v80_v8, 1  ;;  %168 = vmatpush.msra.mxu0 %v134_v16 }
  0x17   :  { %v88_v15 = vrot.slane %v87_v9, 1 }
  0x18   :  { %v95_v17 = vrot.slane %v94_v11, 1  ;;  %v102_v18 = vrot.slane %v101_v12, 1  ;;  %v82_v21 = vadd.f32 %v81_v14, %v80_v8  ;;  %169 = vmatpush.msra.mxu0 %v133_v19 }
  0x19   :  { %v89_v22 = vadd.f32 %v88_v15, %v87_v9 }
  0x1a   :  { %v96_v24 = vadd.f32 %v95_v17, %v94_v11  ;;  %170 = vmatpush.msra.mxu0 %v132_v20  ;;  %v103_v25 = vadd.f32 %v102_v18, %v101_v12  ;;  %v104_v27 = vmul.f32 0.0625, %v82_v21 }
  0x1b   :  { %v105_v28 = vmul.f32 0.0625, %v89_v22 }
  0x1c   :  { %171 = vmatpush.msra.mxu0 %v131_v23  ;;  %v106_v30 = vmul.f32 0.0625, %v96_v24  ;;  %v107_v31 = vmul.f32 0.0625, %v103_v25  ;;  %227 = vlog2.f32 %v104_v27 }
  0x1d   :  { %229 = vlog2.f32 %v105_v28 }
  0x1e   :  { %172 = vmatpush.msra.mxu0 %v130_v26  ;;  %231 = vlog2.f32 %v106_v30 }
  0x1f   :  { %233 = vlog2.f32 %v107_v31 }
  0x20   :  { %173 = vmatpush.msra.mxu0 %v129_v29 }
  0x22   :  { %v228_v32 = vpop.eup %227 }
  0x23   :  { %v230_v33 = vpop.eup %229  ;;  %v109_v36 = vmul.f32 0.6931472, %v228_v32 }
  0x24   :  { %v232_v34 = vpop.eup %231  ;;  %v111_v37 = vmul.f32 0.6931472, %v230_v33 }
  0x25   :  { %v234_v35 = vpop.eup %233  ;;  %v113_v38 = vmul.f32 0.6931472, %v232_v34 }
  0x26   :  { %v115_v39 = vmul.f32 0.6931472, %v234_v35 }
  0x44   :  { %s224_s28 = spop %223 }
  0x45   :  { %v116_v40 = vstv %s224_s28 }
  0x46   :  { %v117_v41 = vmul.f32 %v116_v40, %v109_v36  ;;  %v118_v42 = vmul.f32 %v116_v40, %v111_v37  ;;  %v119_v43 = vmul.f32 %v116_v40, %v113_v38  ;;  %v120_v44 = vmul.f32 %v116_v40, %v115_v39 }
  0x48   :  { %v121_v45 = vmul.f32 1.442695, %v117_v41  ;;  %v123_v46 = vmul.f32 1.442695, %v118_v42  ;;  %v125_v47 = vmul.f32 1.442695, %v119_v43 }
  0x49   :  { %v127_v48 = vmul.f32 1.442695, %v120_v44 }
  0x4a   :  { %235 = vpow2.f32 %v121_v45 }
  0x4b   :  { %237 = vpow2.f32 %v123_v46 }
  0x4c   :  { %239 = vpow2.f32 %v125_v47 }
  0x4d   :  { %241 = vpow2.f32 %v127_v48 }
  0x50   :  { %v236_v49 = vpop.eup %235 }
  0x51   :  { %v238_v50 = vpop.eup %237 }
  0x52   :  { %v240_v51 = vpop.eup %239  ;;  %v152_v52 = vsel %vm151_vm4, %v238_v50, %v236_v49 }
  0x53   :  { %v242_v53 = vpop.eup %241  ;;  %v154_v54 = vsel %vm153_vm5, %v240_v51, %v152_v52 }
  0x54   :  { %v156_v55 = vsel %vm155_vm6, %v242_v53, %v154_v54 }
  0x55   :  { %174 = vmatmul.f32.vlgmr.msra.gmra.mxu0 %v156_v55 }
  0xd2   :  { %v175_v57 = vpop.f32.mrf.mxu0 }
  0xd3   :  { %v176_v58 = vadd.f32 %v175_v57, %v146_v56 }
  0xd5   :  { %v203_v59 = vmul.f32 -1.442695, %v176_v58 }
  0xd7   :  { %243 = vpow2.f32 %v203_v59 }
  0xdd   :  { %v244_v60 = vpop.eup %243 }
  0xde   :  { %v181_v61 = vadd.f32 1.0, %v244_v60 }
  0xe0   :  { %245 = vrcp.f32 %v181_v61  ;;  %v193_v1 = vand.u32 2147483648, %v181_v61  ;;  %v191_v3 = vand.u32 2147483647, %v181_v61  ;;  %vm187_vm8 = vweird.f32 %v181_v61 }
  0xe2   :  { %v194_v5 = vor.u32 1.1754944e-38, %v193_v1  ;;  %vm192_vm11 = vcmp.eq.f32.partialorder %v191_v3, 8.507059e+37 }
  0xe6   :  { %v246_v62 = vpop.eup %245 }
  0xe7   :  { %v183_v63 = vmul.f32 %v246_v62, %v181_v61  ;;  %vm188_vm7 = vweird.f32 %v246_v62 }
  0xe8   :  { %vm189_vm9 = vmor %vm187_vm8, %vm188_vm7 }
  0xe9   :  { %v184_v0 = vsub.f32 1.0, %v183_v63 }
  0xeb   :  { %v185_v2 = vmul.f32 %v246_v62, %v184_v0 }
  0xed   :  { %v186_v4 = vadd.f32 %v246_v62, %v185_v2 }
  0xef   :  { %v190_v6 = vsel %vm189_vm9, %v246_v62, %v186_v4 }
  0xf0   :  { %v195_v7 = vsel %vm192_vm11, %v194_v5, %v190_v6 }
  0xf1   :  { %198 = vst.msk [vmem:[%s352_s4] sm:$0xf] %vm197_vm10, %v195_v7 }

</bundles_post_ra>
